<compile_context>
chip_gen: v6e
topology: v6e:2x2x1
jax: 0.10.0
libtpu: 0.0.40
codegen_flags: <defaults>
</compile_context>

<pallas_src>
import jax
import jax.numpy as jnp
from jax.experimental import pallas as pl
from jax.experimental.pallas import tpu as pltpu


def _model_kernel(c_ref, x_ref, b_ref, o_ref):
    # c_ref: SMEM (1,1) scalar = b1[0] + w2[0,0]
    # x_ref: VMEM (tr, 256) interleaved row-major view of x (128 batch rows / block row)
    # b_ref: VMEM (256, 128) pair-selection matrix, resident across grid steps
    # o_ref: VMEM (tr, 128) lane-dense output tile
    o_ref[...] = (
        jnp.dot(x_ref[...], b_ref[...], preferred_element_type=jnp.float32)
        + c_ref[0, 0]
    )


def model_forward(x, w1, b1, w2, *, tile_r=2048):
    """x: (N, 2). w1: (3,2), b1: (3,), w2: (1,3). Returns (N,) f32."""
    n = x.shape[0]
    x = x.astype(jnp.float32)

    # Each kernel output row covers 128 consecutive batch elements.
    r = pl.cdiv(n, 128)
    if r <= tile_r:
        tr = pl.cdiv(r, 8) * 8      # single step, sublane-aligned
        r_pad = tr
    else:
        tr = tile_r                  # multiple of 8
        r_pad = pl.cdiv(r, tr) * tr
    n_pad = r_pad * 128
    if n_pad != n:
        x = jnp.pad(x, ((0, n_pad - n), (0, 0)))  # only for ragged N

    # Free row-major reshape: row q = [x[128q,0], x[128q,1], x[128q+1,0], ...]
    x2 = x.reshape(r_pad, 256)

    # Pair-selection matrix: B[2m, m] = w1[0,0], B[2m+1, m] = w1[0,1].
    row = jnp.arange(256, dtype=jnp.int32)[:, None]
    col = jnp.arange(128, dtype=jnp.int32)[None, :]
    b_mat = (
        jnp.where(row == 2 * col, w1[0, 0], 0.0)
        + jnp.where(row == 2 * col + 1, w1[0, 1], 0.0)
    ).astype(jnp.float32)

    # Folded scalar constant (ulp-level reassociation vs. reference; within tol).
    c = (b1[0] + w2[0, 0]).astype(jnp.float32).reshape(1, 1)

    grid = (r_pad // tr,)
    cost = pl.CostEstimate(
        flops=2 * r_pad * 256 * 128,
        transcendentals=0,
        bytes_accessed=(r_pad * 256 + r_pad * 128 + 256 * 128 + 1) * 4,
    )

    out = pl.pallas_call(
        _model_kernel,
        out_shape=jax.ShapeDtypeStruct((r_pad, 128), jnp.float32),
        grid=grid,
        in_specs=[
            # Folded scalar constant, whole array in SMEM.
            pl.BlockSpec(memory_space=pltpu.MemorySpace.SMEM),
            # Streamed, double-buffered dense tiles of the interleaved x view.
            pl.BlockSpec((tr, 256), lambda i: (i, 0)),
            # Pair-selection matrix: same block every step -> stays resident in VMEM.
            pl.BlockSpec((256, 128), lambda i: (0, 0)),
        ],
        out_specs=pl.BlockSpec((tr, 128), lambda i: (i, 0)),
        compiler_params=pltpu.CompilerParams(
            dimension_semantics=("parallel",),  # shard tiles across TCs on v7x
        ),
        cost_estimate=cost,
    )(c, x2, b_mat)

    # Free reshape back to (n_pad,), then drop padded tail.
    return out.reshape(-1)[:n]


def init_params(key):
    """Deterministic parameter init with the same shapes as the nn.Module."""
    k1, k2, k3, k4 = jax.random.split(key, 4)
    # Linear(2, 3): weight (3, 2), bias (3,)
    bound1 = 1.0 / jnp.sqrt(2.0)
    w1 = jax.random.uniform(k1, (3, 2), jnp.float32, -bound1, bound1)
    b1 = jax.random.uniform(k2, (3,), jnp.float32, -bound1, bound1)
    # Linear(3, 1): weight (1, 3), bias (1,)  (bias unused in forward)
    bound2 = 1.0 / jnp.sqrt(3.0)
    w2 = jax.random.uniform(k3, (1, 3), jnp.float32, -bound2, bound2)
    _b2 = jax.random.uniform(k4, (1,), jnp.float32, -bound2, bound2)  # unused
    return w1, b1, w2


def _reference(x, w1, b1, w2):
    v1 = x @ w1.T + b1
    return v1[:, 0] + w2[0, 0]


if __name__ == "__main__":
    key = jax.random.PRNGKey(0)
    w1, b1, w2 = init_params(key)

    # 1) Input consistent with the module snippet: x = [[1, 2], [1, 2]].
    x_small = jnp.array([[1.0, 2.0], [1.0, 2.0]], dtype=jnp.float32)
    out_small = jax.block_until_ready(model_forward(x_small, w1, b1, w2))
    ref_small = _reference(x_small, w1, b1, w2)
    assert out_small.shape == (x_small.shape[0],)
    assert jnp.allclose(out_small, ref_small, atol=1e-5), (out_small, ref_small)

    # 2) A larger ragged-N case to exercise padding + dense tiling.
    xk = jax.random.split(key, 5)[4]
    x_big = jax.random.normal(xk, (1000, 2), jnp.float32)
    out_big = jax.block_until_ready(model_forward(x_big, w1, b1, w2))
    ref_big = _reference(x_big, w1, b1, w2)
    assert out_big.shape == (1000,)
    assert jnp.allclose(out_big, ref_big, atol=1e-5)

    print("KERNEL_OK")
</pallas_src>

<mosaic_0001>
module attributes {stable_mosaic.version = 11 : i64} {
  func.func @_model_kernel(%arg0: i32, %arg1: memref<1x1xf32, #tpu.memory_space<smem>>, %arg2: memref<8x256xf32, #tpu.memory_space<vmem>>, %arg3: memref<256x128xf32, #tpu.memory_space<vmem>>, %arg4: memref<8x128xf32, #tpu.memory_space<vmem>>) attributes {dimension_semantics = [#tpu.dimension_semantics<parallel>], iteration_bounds = array<i64: 1>, scalar_prefetch = 0 : i64, scratch_operands = 0 : i64, tpu.core_type = #tpu.core_type<tc>, window_params = [{transform_indices = @transform_0, window_bounds = array<i64: 1, 1>}, {transform_indices = @transform_1, window_bounds = array<i64: 8, 256>}, {pipeline_mode = #tpu.pipeline_mode<synchronous>, transform_indices = @transform_2, window_bounds = array<i64: 256, 128>}, {transform_indices = @transform_3, window_bounds = array<i64: 8, 128>}]} {
    %c0 = arith.constant 0 : index
    %c0_0 = arith.constant 0 : index
    %0 = vector.load %arg2[%c0, %c0_0] : memref<8x256xf32, #tpu.memory_space<vmem>>, vector<8x256xf32>
    %c0_1 = arith.constant 0 : index
    %c0_2 = arith.constant 0 : index
    %1 = vector.load %arg3[%c0_1, %c0_2] : memref<256x128xf32, #tpu.memory_space<vmem>>, vector<256x128xf32>
    %cst = arith.constant dense<0.000000e+00> : vector<8x128xf32>
    %2 = tpu.matmul %0, %1, %cst {dimension_numbers = #tpu.dot_dimension_numbers<[1], [0], [0], [1], [0, 0, 1, 1], [], []>} : vector<8x256xf32>, vector<256x128xf32>, vector<8x128xf32> -> vector<8x128xf32>
    %c0_3 = arith.constant 0 : index
    %c0_4 = arith.constant 0 : index
    %3 = memref.load %arg1[%c0_3, %c0_4] : memref<1x1xf32, #tpu.memory_space<smem>>
    %4 = vector.broadcast %3 : f32 to vector<8x128xf32>
    %5 = arith.addf %2, %4 : vector<8x128xf32>
    %c0_5 = arith.constant 0 : index
    %c0_6 = arith.constant 0 : index
    %6 = vector.load %arg4[%c0_5, %c0_6] : memref<8x128xf32, #tpu.memory_space<vmem>>, vector<8x128xf32>
    tpu.vector_store %arg4[%c0_5, %c0_6], %5 {strides = array<i32>} : memref<8x128xf32, #tpu.memory_space<vmem>>, vector<8x128xf32>,
    return
  }
  func.func @transform_0(%arg0: i32) -> (i32, i32) {
    %c0_i32 = arith.constant 0 : i32
    %c0_i32_0 = arith.constant 0 : i32
    %c0_i32_1 = arith.constant 0 : i32
    return %c0_i32, %c0_i32_0 : i32, i32
  }
  func.func @transform_1(%arg0: i32) -> (i32, i32) {
    %c0_i32 = arith.constant 0 : i32
    %c0_i32_0 = arith.constant 0 : i32
    return %arg0, %c0_i32 : i32, i32
  }
  func.func @transform_2(%arg0: i32) -> (i32, i32) {
    %c0_i32 = arith.constant 0 : i32
    %c0_i32_0 = arith.constant 0 : i32
    %c0_i32_1 = arith.constant 0 : i32
    return %c0_i32, %c0_i32_0 : i32, i32
  }
  func.func @transform_3(%arg0: i32) -> (i32, i32) {
    %c0_i32 = arith.constant 0 : i32
    %c0_i32_0 = arith.constant 0 : i32
    return %arg0, %c0_i32 : i32, i32
  }
}

</mosaic_0001>

<bundles_post_ra>
// kernel: tpu_custom_call.1
= control target key start
LH: loop header
LB: loop body
LE: loop exit
PB: predicated region body
PF: predicated region fallthrough
CT: control target
= control target key end

     0   :  { %9 = vsyncpa [#allocation4], 0  ;;  %s308_s0 = inlined_call_operand.<no memory space> [shape: f32[1,1], index: 0, kind: input, shape index: {}]   ;;  %s309_s1 = inlined_call_operand.hbm [shape: f32[8,256], index: 1, kind: input, shape index: {}]   ;;  %s310_s2 = inlined_call_operand.hbm [shape: f32[256,128], index: 2, kind: input, shape index: {}]   ;;  %s311_s3 = inlined_call_operand.hbm [shape: f32[8,128], index: 3, kind: output, shape index: {}]  }
   0x1   :  { %10 = vsyncpa [#allocation7], 0 }
   0x2   :  { %11 = vsyncpa [#allocation5], 0  ;;  %s271_s12 = smov [#allocation3]   ;;  %s272_s14 = smov [#allocation6]  }
   0x3   :  { %s20_s13 = sshll.u32 %s271_s12, 4  ;;  %s29_s15 = sshll.u32 %s272_s14, 4  ;;  %s21_s13 = int_to_ptr.vmem [resolvable:$true] %s20_s13  ;;  %s30_s15 = int_to_ptr.vmem [resolvable:$true] %s29_s15 }
   0x4   :  { %s213_s16 = scalar_lea.vmem %s21_s13, 256  ;;  %p218_p1 = scmp.lt.s32.totalorder %s21_s13, %s21_s13 }
   0x5   :  { %p214_p0 = scmp.ne.s32.totalorder %s21_s13, %s213_s16  ;;  %p219_p2 = scmp.lt.s32.totalorder %s213_s16, %s213_s16 }
   0x7   :  { %p220_p3 = por %p219_p2, %p218_p1 }
   0x9   :  { %p221_p4 = pnand %p220_p3, %p214_p0 }
   0xb   :  { %224 = shalt.err (!%p221_p4)
}
   0xc   :  { %23 = dma.hbm_to_vmem [thread:$0]  %s309_s1, 256, %s21_s13, [#allocation4]  }
   0xd   :  { %s233_s19 = scalar_lea.vmem %s30_s15, 4096  ;;  %p238_p6 = scmp.lt.s32.totalorder %s30_s15, %s30_s15 }
   0xe   :  { %p234_p5 = scmp.ne.s32.totalorder %s30_s15, %s233_s19  ;;  %p239_p7 = scmp.lt.s32.totalorder %s233_s19, %s233_s19 }
  0x10   :  { %p240_p8 = por %p239_p7, %p238_p6 }
  0x12   :  { %p241_p9 = pnand %p240_p8, %p234_p5 }
  0x14   :  { %244 = shalt.err (!%p241_p9)
}
  0x15   :  { %s273_s20 = smov 128   ;;  %s274_s21 = smov 8  }
  0x16   :  { %35 = dma.hbm_to_vmem [thread:$0]  %s310_s2, 4096, %s30_s15, [#allocation7], %s273_s20, %s273_s20, %s274_s21  }
  0x17   :  { %265 = dma.done.wait [#allocation4], 256  }
  0x18   :  { %266 = vsyncadd [#allocation4], 4294967040 }
  0x19   :  { %267 = dma.done.wait [#allocation7], 4096  }
  0x1a   :  { %268 = vsyncadd [#allocation7], 4294963200  ;;  %v75_v0 = vld [vmem:[#allocation6 + $0xf8] sm:$0xff]  ;;  %v74_v2 = vld [vmem:[#allocation6 + $0xf0] sm:$0xff]  ;;  %v77_v35 = vstv %s308_s0  ;;  %s275_s24 = smov [#allocation8]  }
  0x1b   :  { %v59_v1 = vld [vmem:[#allocation6 + $0x78] sm:$0xff]  ;;  %165 = vmatprep.subr.mxu0 %v75_v0  ;;  %v58_v3 = vld [vmem:[#allocation6 + $0x70] sm:$0xff]  ;;  %v73_v4 = vld [vmem:[#allocation6 + $0xe8] sm:$0xff]  ;;  %s155_s25 = sshll.u32 %s275_s24, 4  ;;  %s156_s25 = int_to_ptr.vmem [resolvable:$true] %s155_s25 }
  0x1c   :  { %166 = vmatpush3.msra.mxu0 %v59_v1  ;;  %v57_v5 = vld [vmem:[#allocation6 + $0x68] sm:$0xff]  ;;  %v72_v6 = vld [vmem:[#allocation6 + $0xe0] sm:$0xff]  ;;  %v71_v8 = vld [vmem:[#allocation6 + $0xd8] sm:$0xff]  ;;  %s245_s26 = scalar_lea.vmem %s156_s25, 128  ;;  %p250_p11 = scmp.lt.s32.totalorder %s156_s25, %s156_s25 }
  0x1d   :  { %167 = vmatprep.subr.mxu0 %v74_v2  ;;  %v56_v7 = vld [vmem:[#allocation6 + $0x60] sm:$0xff]  ;;  %v55_v9 = vld [vmem:[#allocation6 + $0x58] sm:$0xff]  ;;  %v70_v10 = vld [vmem:[#allocation6 + $0xd0] sm:$0xff]  ;;  %p246_p10 = scmp.ne.s32.totalorder %s156_s25, %s245_s26  ;;  %p251_p12 = scmp.lt.s32.totalorder %s245_s26, %s245_s26 }
  0x1e   :  { %168 = vmatpush3.msra.mxu0 %v58_v3  ;;  %v54_v11 = vld [vmem:[#allocation6 + $0x50] sm:$0xff]  ;;  %v69_v12 = vld [vmem:[#allocation6 + $0xc8] sm:$0xff]  ;;  %v43_v13 = vld [vmem:[#allocation3 + $0x8] sm:$0xff] }
  0x1f   :  { %169 = vmatprep.subr.mxu0 %v73_v4  ;;  %v53_v14 = vld [vmem:[#allocation6 + $0x48] sm:$0xff]  ;;  %142 = vmatprep.mubr.f32.mxu0 %v43_v13  ;;  %v68_v15 = vld [vmem:[#allocation6 + $0xc0] sm:$0xff]  ;;  %v67_v17 = vld [vmem:[#allocation6 + $0xb8] sm:$0xff]  ;;  %p252_p13 = por %p251_p12, %p250_p11 }
  0x20   :  { %170 = vmatpush3.msra.mxu0 %v57_v5  ;;  %v52_v16 = vld [vmem:[#allocation6 + $0x40] sm:$0xff]  ;;  %v51_v18 = vld [vmem:[#allocation6 + $0x38] sm:$0xff]  ;;  %v66_v19 = vld [vmem:[#allocation6 + $0xb0] sm:$0xff] }
  0x21   :  { %171 = vmatprep.subr.mxu0 %v72_v6  ;;  %v50_v20 = vld [vmem:[#allocation6 + $0x30] sm:$0xff]  ;;  %v65_v21 = vld [vmem:[#allocation6 + $0xa8] sm:$0xff]  ;;  %v64_v23 = vld [vmem:[#allocation6 + $0xa0] sm:$0xff]  ;;  %p253_p0 = pnand %p252_p13, %p246_p10 }
  0x22   :  { %172 = vmatpush3.msra.mxu0 %v56_v7  ;;  %v49_v22 = vld [vmem:[#allocation6 + $0x28] sm:$0xff]  ;;  %v48_v24 = vld [vmem:[#allocation6 + $0x20] sm:$0xff]  ;;  %v63_v25 = vld [vmem:[#allocation6 + $0x98] sm:$0xff] }
  0x23   :  { %173 = vmatprep.subr.mxu0 %v71_v8  ;;  %v47_v26 = vld [vmem:[#allocation6 + $0x18] sm:$0xff]  ;;  %v62_v27 = vld [vmem:[#allocation6 + $0x90] sm:$0xff]  ;;  %v61_v29 = vld [vmem:[#allocation6 + $0x88] sm:$0xff] }
  0x24   :  { %174 = vmatpush3.msra.mxu0 %v55_v9  ;;  %v46_v28 = vld [vmem:[#allocation6 + $0x10] sm:$0xff]  ;;  %v45_v30 = vld [vmem:[#allocation6 + $0x8] sm:$0xff]  ;;  %v60_v31 = vld [vmem:[#allocation6 + $0x80] sm:$0xff] }
  0x25   :  { %175 = vmatprep.subr.mxu0 %v70_v10  ;;  %v44_v32 = vld [vmem:[#allocation6] sm:$0xff]  ;;  %v42_v33 = vld [vmem:[#allocation3] sm:$0xff] }
  0x26   :  { %176 = vmatpush3.msra.mxu0 %v54_v11 }
  0x27   :  { %177 = vmatprep.subr.mxu0 %v69_v12 }
  0x28   :  { %178 = vmatpush3.msra.mxu0 %v53_v14 }
  0x29   :  { %179 = vmatprep.subr.mxu0 %v68_v15 }
  0x2a   :  { %180 = vmatpush3.msra.mxu0 %v52_v16 }
  0x2b   :  { %181 = vmatprep.subr.mxu0 %v67_v17 }
  0x2c   :  { %182 = vmatpush3.msra.mxu0 %v51_v18 }
  0x2d   :  { %183 = vmatprep.subr.mxu0 %v66_v19 }
  0x2e   :  { %184 = vmatpush3.msra.mxu0 %v50_v20 }
  0x2f   :  { %185 = vmatprep.subr.mxu0 %v65_v21 }
  0x30   :  { %186 = vmatpush3.msra.mxu0 %v49_v22 }
  0x31   :  { %187 = vmatprep.subr.mxu0 %v64_v23 }
  0x32   :  { %188 = vmatpush3.msra.mxu0 %v48_v24 }
  0x33   :  { %189 = vmatprep.subr.mxu0 %v63_v25 }
  0x34   :  { %190 = vmatpush3.msra.mxu0 %v47_v26 }
  0x35   :  { %191 = vmatprep.subr.mxu0 %v62_v27 }
  0x36   :  { %192 = vmatpush3.msra.mxu0 %v46_v28 }
  0x37   :  { %193 = vmatprep.subr.mxu0 %v61_v29 }
  0x38   :  { %194 = vmatpush3.msra.mxu0 %v45_v30 }
  0x39   :  { %195 = vmatprep.subr.mxu0 %v60_v31 }
  0x3a   :  { %196 = vmatpush3.msra.mxu0 %v44_v32 }
  0x3b   :  { %143 = vmatmul.mubr.f32.vlgmr.msra.gmra.mxu0 %v42_v33 }
  0xfb   :  { %v197_v34 = vpop.f32.mrf.mxu0 }
  0xfd   :  { %v198_v36 = vpop.f32.mrf.mxu0 }
  0xfe   :  { %v199_v37 = vadd.f32 %v198_v36, %v197_v34 }
 0x100   :  { %v145_v38 = vadd.f32 %v199_v37, %v77_v35 }
 0x102   :  { %148 = vst [vmem:[#allocation8] sm:$0xff] %v145_v38 }
 0x103   :  { %256 = shalt.err (!%p253_p0)
}
 0x104   :  { %158 = dma.vmem_to_hbm [thread:$0]  %s156_s25, 128, %s311_s3, [#allocation5]  }
 0x105   :  { %269 = dma.done.wait [#allocation5], 128  }
 0x106   :  { %270 = vsyncadd [#allocation5], 4294967168 }
 0x107   :  { %162 = vsyncpa [#allocation4], 1 }
 0x108   :  { %163 = vsyncpa [#allocation7], 1 }
 0x109   :  { %164 = vsyncpa [#allocation5], 1 }

</bundles_post_ra>
